<compile_context>
chip_gen: v7x
topology: tpu7x:2x2x1
jax: 0.10.0
libtpu: 0.0.40
codegen_flags: <defaults>
</compile_context>

<pallas_src>
import jax
import jax.numpy as jnp
from jax.experimental import pallas as pl
from jax.experimental.pallas import tpu as pltpu

_LANE = 128
_VMEM_LIMIT_BYTES = 32 * 1024 * 1024   # safe scoped-VMEM limit on v5e/v6e/v7x
_TILE_BUDGET_BYTES = 8 * 1024 * 1024   # in+out bytes per pipeline buffer (x2 w/ double-buffering)


# ----------------------------------------------------------------------------
# Kernels
# ----------------------------------------------------------------------------
def _transpose2d_kernel(x_ref, o_ref):
    # x_ref: (tc, tl), o_ref: (tl, tc) -- batch dim squeezed away.
    # Pure XLU transpose of a (sublane, lane) tile; no elementwise work.
    o_ref[...] = x_ref[...].T


def _transpose_batched_kernel(x_ref, o_ref):
    # x_ref: (tb, C, L), o_ref: (tb, L, C) -- several batches fused per step.
    o_ref[...] = jnp.transpose(x_ref[...], (0, 2, 1))


# ----------------------------------------------------------------------------
# Tiling helpers (all trace-time Python)
# ----------------------------------------------------------------------------
def _round_up(x: int, m: int) -> int:
    return ((x + m - 1) // m) * m


def _sublane_mult(itemsize: int) -> int:
    # f32 -> 8, bf16 -> 16, int8/fp8 -> 32 (packed sublanes).
    return max(8, 8 * 4 // itemsize)


def _padded_plane_bytes(rows: int, cols: int, itemsize: int) -> int:
    """VMEM footprint of one (rows, cols) tile after (sublane, lane) padding."""
    return _round_up(rows, _sublane_mult(itemsize)) * _round_up(cols, _LANE) * itemsize


def _pick_tile(dim: int, cap: int) -> int:
    """Tile size for one side of the (C, L) plane.

    dim < 128: block must equal the full dim (allowed by the (8,128) rule).
    dim >= 128: pick the multiple of 128 (<= cap, <= dim) that minimizes the
    ragged-edge padding; prefer the larger tile on ties (fewer grid steps).
    """
    if dim < _LANE:
        return dim
    best, best_waste = _LANE, None
    for k in range(1, cap // _LANE + 1):
        t = _LANE * k
        if t > dim:
            break
        waste = t * pl.cdiv(dim, t) - dim
        if best_waste is None or waste <= best_waste:
            best, best_waste = t, waste
    return best


def _tile_caps(C: int, L: int, itemsize: int):
    """Per-dim tile caps, VMEM-budgeted; stretch the big dim when the other is tiny."""
    base = 1024 if itemsize <= 4 else 512
    cap_c, cap_l = base, base
    half_budget = _TILE_BUDGET_BYTES // 2
    if C < _LANE:
        # Output lane dim is C (< 128) => masked vst; amortize with long L tiles.
        cap_l = min(4096, max(base, _LANE * (half_budget // (max(C, 1) * itemsize) // _LANE)))
    if L < _LANE:
        cap_c = min(4096, max(base, _LANE * (half_budget // (max(L, 1) * itemsize) // _LANE)))
    return cap_c, cap_l


def _ordered_grid(nb: int, nc: int, nl: int):
    """Order grid axes largest-extent-first (megacore shards leading parallel dims)."""
    counts = {"b": nb, "c": nc, "l": nl}
    prio = {"l": 0, "c": 1, "b": 2}
    axes = sorted(counts, key=lambda a: (-counts[a], prio[a]))
    pos = {a: i for i, a in enumerate(axes)}
    bi, ci, li = pos["b"], pos["c"], pos["l"]
    grid = tuple(counts[a] for a in axes)
    in_map = lambda i0, i1, i2: ((i0, i1, i2)[bi], (i0, i1, i2)[ci], (i0, i1, i2)[li])
    out_map = lambda i0, i1, i2: ((i0, i1, i2)[bi], (i0, i1, i2)[li], (i0, i1, i2)[ci])
    return grid, in_map, out_map


# ----------------------------------------------------------------------------
# Public wrapper
# ----------------------------------------------------------------------------
def permute21(x: jax.Array) -> jax.Array:
    """Pallas equivalent of torch `x.permute(0, 2, 1)` for a 3-D array."""
    B, C, L = x.shape
    itemsize = jnp.dtype(x.dtype).itemsize
    out_shape = jax.ShapeDtypeStruct((B, L, C), x.dtype)
    cost = pl.CostEstimate(
        flops=0, transcendentals=0, bytes_accessed=2 * B * C * L * itemsize
    )

    # Per-batch (C, L) plane footprint in VMEM: input tile + output tile.
    plane_bytes = (_padded_plane_bytes(C, L, itemsize)
                   + _padded_plane_bytes(L, C, itemsize))

    if plane_bytes <= _TILE_BUDGET_BYTES // 8:
        # --- Batch-fused path: C and L both small --------------------------
        tb = max(1, min(B, _TILE_BUDGET_BYTES // plane_bytes))
        grid = (pl.cdiv(B, tb),)
        return pl.pallas_call(
            _transpose_batched_kernel,
            out_shape=out_shape,
            grid_spec=pl.GridSpec(
                grid=grid,
                in_specs=[pl.BlockSpec((tb, C, L), lambda b: (b, 0, 0))],
                out_specs=pl.BlockSpec((tb, L, C), lambda b: (b, 0, 0)),
            ),
            compiler_params=pltpu.CompilerParams(
                dimension_semantics=("parallel",),
                vmem_limit_bytes=_VMEM_LIMIT_BYTES,
            ),
            cost_estimate=cost,
        )(x)

    # --- Tiled path: 2-D tiling of the (C, L) plane, batch dim squeezed ----
    cap_c, cap_l = _tile_caps(C, L, itemsize)
    tc = _pick_tile(C, cap_c)
    tl = _pick_tile(L, cap_l)
    grid, in_map, out_map = _ordered_grid(B, pl.cdiv(C, tc), pl.cdiv(L, tl))
    return pl.pallas_call(
        _transpose2d_kernel,
        out_shape=out_shape,
        grid_spec=pl.GridSpec(
            grid=grid,
            in_specs=[pl.BlockSpec((pl.Squeezed(), tc, tl), in_map)],
            out_specs=pl.BlockSpec((pl.Squeezed(), tl, tc), out_map),
        ),
        compiler_params=pltpu.CompilerParams(
            dimension_semantics=("parallel", "parallel", "parallel"),
            vmem_limit_bytes=_VMEM_LIMIT_BYTES,
        ),
        cost_estimate=cost,
    )(x)


if __name__ == "__main__":
    key = jax.random.PRNGKey(0)
    k0, k1, k2 = jax.random.split(key, 3)

    # 1) The module's real regime: tiny per-batch plane -> batch-fused path.
    B, C, L = 2, 4, 16
    x = jax.random.normal(k0, (B, C, L), dtype=jnp.float32)
    y = permute21(x)
    jax.block_until_ready(y)
    assert y.shape == (B, L, C)
    assert jnp.array_equal(y, jnp.transpose(x, (0, 2, 1)))

    # 2) Large 128-multiple shape -> tiled (squeezed-batch) path, lane-dense stores.
    x2 = jax.random.normal(k1, (2, 256, 1024), dtype=jnp.float32)
    y2 = permute21(x2)
    jax.block_until_ready(y2)
    assert y2.shape == (2, 1024, 256)
    assert jnp.array_equal(y2, jnp.transpose(x2, (0, 2, 1)))

    # 3) Ragged (non-128-multiple) shape -> tiled path with masked edge blocks.
    x3 = jax.random.normal(k2, (3, 520, 1030), dtype=jnp.float32)
    y3 = permute21(x3)
    jax.block_until_ready(y3)
    assert y3.shape == (3, 1030, 520)
    assert jnp.array_equal(y3, jnp.transpose(x3, (0, 2, 1)))

    print("KERNEL_OK")
</pallas_src>

<mosaic_0001>
module attributes {stable_mosaic.version = 11 : i64} {
  func.func @_transpose_batched_kernel(%arg0: i32, %arg1: memref<2x4x16xf32, #tpu.memory_space<vmem>>, %arg2: memref<2x16x4xf32, #tpu.memory_space<vmem>>) attributes {dimension_semantics = [#tpu.dimension_semantics<parallel>], iteration_bounds = array<i64: 1>, scalar_prefetch = 0 : i64, scratch_operands = 0 : i64, tpu.core_type = #tpu.core_type<tc>, window_params = [{transform_indices = @transform_0, window_bounds = array<i64: 2, 4, 16>}, {transform_indices = @transform_1, window_bounds = array<i64: 2, 16, 4>}]} {
    %c0 = arith.constant 0 : index
    %c0_0 = arith.constant 0 : index
    %c0_1 = arith.constant 0 : index
    %0 = vector.load %arg1[%c0, %c0_0, %c0_1] : memref<2x4x16xf32, #tpu.memory_space<vmem>>, vector<2x4x16xf32>
    %1 = tpu.transpose %0, [0, 2, 1] : vector<2x4x16xf32> -> vector<2x16x4xf32>
    %c0_2 = arith.constant 0 : index
    %c0_3 = arith.constant 0 : index
    %c0_4 = arith.constant 0 : index
    %2 = vector.load %arg2[%c0_2, %c0_3, %c0_4] : memref<2x16x4xf32, #tpu.memory_space<vmem>>, vector<2x16x4xf32>
    tpu.vector_store %arg2[%c0_2, %c0_3, %c0_4], %1 {strides = array<i32>} : memref<2x16x4xf32, #tpu.memory_space<vmem>>, vector<2x16x4xf32>,
    return
  }
  func.func @transform_0(%arg0: i32) -> (i32, i32, i32) {
    %c0_i32 = arith.constant 0 : i32
    %c0_i32_0 = arith.constant 0 : i32
    %c0_i32_1 = arith.constant 0 : i32
    return %arg0, %c0_i32, %c0_i32_0 : i32, i32, i32
  }
  func.func @transform_1(%arg0: i32) -> (i32, i32, i32) {
    %c0_i32 = arith.constant 0 : i32
    %c0_i32_0 = arith.constant 0 : i32
    %c0_i32_1 = arith.constant 0 : i32
    return %arg0, %c0_i32, %c0_i32_0 : i32, i32, i32
  }
}

</mosaic_0001>

<bundles_post_ra>
// kernel: tpu_custom_call.1
= control target key start
LH: loop header
LB: loop body
LE: loop exit
PB: predicated region body
PF: predicated region fallthrough
CT: control target
= control target key end

     0   :  { %6 = vsyncpa [#allocation3], 0  ;;  %s126_s6 = smov [#allocation2]   ;;  %s163_s0 = inlined_call_operand.hbm [shape: f32[2,4,16], index: 0, kind: input, shape index: {}]   ;;  %s164_s1 = inlined_call_operand.vmem [shape: f32[2,16,4], index: 1, kind: output, shape index: {}]  }
   0x1   :  { %s12_s7 = sshll.u32 %s126_s6, 4  ;;  %s102_s10 = scalar_lea.hbm %s163_s0, 128  ;;  %s13_s7 = int_to_ptr.vmem [resolvable:$true] %s12_s7 }
   0x2   :  { %p103_p0 = scmp.ne.s32.totalorder %s163_s0, %s102_s10  ;;  %p106_p1 = scmp.lt.u32.totalorder %s102_s10, %s163_s0 }
   0x4   :  { %p108_p2 = pnand %p106_p1, %p103_p0 }
   0x6   :  { %111 = shalt.err (!%p108_p2)
}
   0x7   :  { %s112_s15 = scalar_lea.vmem %s13_s7, 128  ;;  %p117_p4 = scmp.lt.s32.totalorder %s13_s7, %s13_s7 }
   0x8   :  { %p113_p3 = scmp.ne.s32.totalorder %s13_s7, %s112_s15  ;;  %p118_p5 = scmp.lt.s32.totalorder %s112_s15, %s112_s15 }
   0xa   :  { %p119_p6 = por %p118_p5, %p117_p4 }
   0xc   :  { %p120_p7 = pnand %p119_p6, %p113_p3 }
   0xe   :  { %123 = shalt.err (!%p120_p7)
}
   0xf   :  { %s127_s16 = smov 64   ;;  %s128_s17 = smov 4  }
  0x10   :  { %18 = dma.hbm_to_vmem [thread:$0]  %s163_s0, 128, %s13_s7, [#allocation3], %s127_s16, %s127_s16, %s128_s17  }
  0x11   :  { %124 = dma.done.wait [#allocation3], 128  }
  0x12   :  { %125 = vsyncadd [#allocation3], 4294967168  ;;  %v22_v0 = vld [vmem:[#allocation2] sm:$0xf]  ;;  %v23_v1 = vld [vmem:[#allocation2 + $0x4] sm:$0xf] }
  0x13   :  { %24 = vxpose.xlu0.b32.start.end [1/1] (short) (narrow) %v22_v0, 16  ;;  %vm88_vm0 = vcmask 31744  }
  0x18   :  { %56 = vxpose.xlu0.b32.start.end [1/1] (short) (narrow) %v23_v1, 16 }
  0x93   :  { %v40_v2 = vpop.trf.xlu0 }
  0x94   :  { %89 = vst.msk [vmem:[%s164_s1] sm:$0xff] %vm88_vm0, %v40_v2 }
  0x97   :  { %v41_v3 = vpop.trf.xlu0 }
  0x98   :  { %90 = vst.msk [vmem:[%s164_s1 + $0x8] sm:$0xff] %vm88_vm0, %v41_v3 }
  0x9b   :  { %v72_v4 = vpop.trf.xlu0 }
  0x9c   :  { %91 = vst.msk [vmem:[%s164_s1 + $0x10] sm:$0xff] %vm88_vm0, %v72_v4 }
  0x9f   :  { %v73_v5 = vpop.trf.xlu0 }
  0xa0   :  { %92 = vst.msk [vmem:[%s164_s1 + $0x18] sm:$0xff] %vm88_vm0, %v73_v5 }
  0xa1   :  { %97 = vsyncpa [#allocation3], 1 }

</bundles_post_ra>
